<compile_context>
chip_gen: v5e
topology: v5e:2x2
jax: 0.10.0
libtpu: 0.0.40
codegen_flags: <defaults>
</compile_context>

<pallas_src>
import math
import jax
import jax.numpy as jnp
from jax.experimental import pallas as pl

# ---------------- configuration (small, consistent with the module) ---------
B = 2          # batch_size
N = 8          # n_patches (sequence length)
D = 32         # hidden_dim
H = 4          # n_heads
HD = D // H    # head_dim
FF = 2 * D     # ff_expension_ratio * hidden_dim
EPS = 1e-5

# MXU-operand dtype (accumulation is always float32).  bfloat16 is native on
# v5e/v6e/v7x; switch to jnp.float32 only for exact-f32 parity debugging.
MATMUL_DTYPE = jnp.bfloat16
USE_APPROX_RECIP = (MATMUL_DTYPE != jnp.float32)

# Lane offsets of each weight matrix inside the bf16 weight slab (128-aligned).
_WQKV_COL, _WO_COL, _W1_COL, _W2_COL = 0, 128, 256, 384
_WSLAB_ROWS, _WSLAB_COLS = 64, 512


def _layer_norm(v, g, b):
    mu = jnp.mean(v, axis=-1, keepdims=True)
    d = v - mu
    var = jnp.mean(d * d, axis=-1, keepdims=True)
    return d * jax.lax.rsqrt(var + EPS) * g + b


# ---------------------------- Pallas kernel ---------------------------------
def hw_encoder_kernel(x_ref, mask_ref, b_ref, w_ref, out_ref):
    x = x_ref[...]                       # (B*N, D) f32, all tokens at once
    mask_bias = mask_ref[...]            # (B, 1, N) additive: -1e30 pad, else 0

    # ---- static slices of the two parameter slabs (cheap views) ----
    ln1_g = b_ref[0:1, 0:D]
    ln1_b = b_ref[1:2, 0:D]
    bqkv  = b_ref[2:3, 0:3 * D]
    bo    = b_ref[3:4, 0:D]
    ln2_g = b_ref[4:5, 0:D]
    ln2_b = b_ref[5:6, 0:D]
    b1    = b_ref[6:7, 0:FF]
    b2    = b_ref[7:8, 0:D]

    wqkv = w_ref[0:D, _WQKV_COL:_WQKV_COL + 3 * D]     # (D, 3D)
    wo   = w_ref[0:D, _WO_COL:_WO_COL + D]             # (D, D)
    w1   = w_ref[0:D, _W1_COL:_W1_COL + FF]            # (D, FF)
    w2   = w_ref[0:FF, _W2_COL:_W2_COL + D]            # (FF, D)

    # ---- LayerNorm 1 (f32 VPU/EUP work) ----
    xn = _layer_norm(x, ln1_g, ln1_b)                  # (B*N, D)

    # ---- fused QKV projection: one MXU matmul + one bias add ----
    qkv = jnp.dot(xn.astype(MATMUL_DTYPE), wqkv,
                  preferred_element_type=jnp.float32) + bqkv      # (B*N, 3D) f32
    qkv_mm = qkv.astype(MATMUL_DTYPE)                  # single cast for all heads

    # ---- multi-head self-attention (1/sqrt(HD) pre-folded into Wq/bq) ----
    # Per-head outputs are accumulated directly through the matching HD-row
    # block of W_o (no scratch, no masked lane-slice stores).
    attn = jnp.zeros((B * N, D), jnp.float32) + bo     # seed with out-proj bias
    for h in range(H):
        lo = h * HD
        qh = qkv_mm[:, lo:lo + HD].reshape(B, N, HD)
        kh = qkv_mm[:, D + lo:D + lo + HD].reshape(B, N, HD)
        vh = qkv_mm[:, 2 * D + lo:2 * D + lo + HD].reshape(B, N, HD)

        s = jnp.einsum("bqd,bkd->bqk", qh, kh,
                       preferred_element_type=jnp.float32)        # (B, N, N) f32
        s = s + mask_bias                                         # key padding
        s = s - jnp.max(s, axis=-1, keepdims=True)                # overflow safety
        p = jnp.exp(s)
        denom = jnp.sum(p, axis=-1, keepdims=True)
        if USE_APPROX_RECIP:
            p = p * pl.reciprocal(denom, approx=True)             # EUP slot
        else:
            p = p / denom                                         # exact (parity)

        oh = jnp.einsum("bqk,bkd->bqd", p.astype(MATMUL_DTYPE), vh,
                        preferred_element_type=jnp.float32)       # (B, N, HD)
        attn = attn + jnp.dot(oh.reshape(B * N, HD).astype(MATMUL_DTYPE),
                              wo[lo:lo + HD, :],
                              preferred_element_type=jnp.float32)

    # dropout(eval) == identity; residual add
    x1 = x + attn

    # ---- LayerNorm 2 + feed-forward (Linear -> ReLU -> Linear) ----
    xn2 = _layer_norm(x1, ln2_g, ln2_b)
    hdn = jnp.dot(xn2.astype(MATMUL_DTYPE), w1,
                  preferred_element_type=jnp.float32) + b1
    hdn = jnp.maximum(hdn, 0.0)                                   # ReLU (f32)
    ffo = jnp.dot(hdn.astype(MATMUL_DTYPE), w2,
                  preferred_element_type=jnp.float32) + b2

    out_ref[...] = x1 + ffo


# ------------------------------- wrapper -------------------------------------
@jax.jit
def hw_encoder(x, src_padding_mask, kparams):
    """x: (B, N, D) f32; src_padding_mask: (B, N) bool (True = pad).

    Single kernel invocation (no grid); 4 input DMAs total (x, mask, 2 slabs).
    """
    x_flat = x.reshape(B * N, D)
    mask_bias = jnp.where(src_padding_mask, -1e30, 0.0).astype(jnp.float32)
    mask_bias = mask_bias.reshape(B, 1, N)

    out_flat = pl.pallas_call(
        hw_encoder_kernel,
        out_shape=jax.ShapeDtypeStruct((B * N, D), jnp.float32),
    )(x_flat, mask_bias, kparams["b_slab"], kparams["w_slab"])
    return out_flat.reshape(B, N, D)


def prepare_kernel_params(p):
    """One-time (init-time) packing of torch-layout params into two slabs:
       * fuse Q/K/V and fold the 1/sqrt(head_dim) attention scale into Wq/bq,
       * (8, 128) f32 slab: one LayerNorm/bias vector per row (lane-0 aligned),
       * (64, 512) bf16 slab: wqkv / wo / w1 / w2, each on a 128-lane boundary.
    """
    scale = 1.0 / math.sqrt(HD)
    wqkv = jnp.concatenate([p["wq"] * scale, p["wk"], p["wv"]], axis=1)  # (D, 3D)
    bqkv = jnp.concatenate([p["bq"] * scale, p["bk"], p["bv"]], axis=1)  # (1, 3D)

    def row(vec):
        v = vec.reshape(-1)
        return jnp.zeros((1, 128), jnp.float32).at[0, :v.shape[0]].set(v)

    b_slab = jnp.concatenate(
        [row(p["ln1_g"]), row(p["ln1_b"]), row(bqkv), row(p["bo"]),
         row(p["ln2_g"]), row(p["ln2_b"]), row(p["b1"]), row(p["b2"])], axis=0)

    w_slab = jnp.zeros((_WSLAB_ROWS, _WSLAB_COLS), jnp.float32)
    w_slab = w_slab.at[0:D, _WQKV_COL:_WQKV_COL + 3 * D].set(wqkv)
    w_slab = w_slab.at[0:D, _WO_COL:_WO_COL + D].set(p["wo"])
    w_slab = w_slab.at[0:D, _W1_COL:_W1_COL + FF].set(p["w1"])
    w_slab = w_slab.at[0:FF, _W2_COL:_W2_COL + D].set(p["w2"])
    w_slab = w_slab.astype(MATMUL_DTYPE)

    return {"b_slab": b_slab, "w_slab": w_slab}


# ---------------------- pure-JAX reference (for sanity) ----------------------
def hw_encoder_ref(x, src_padding_mask, p):
    def ln(v, g, b):
        mu = jnp.mean(v, axis=-1, keepdims=True)
        var = jnp.mean((v - mu) ** 2, axis=-1, keepdims=True)
        return (v - mu) / jnp.sqrt(var + EPS) * g + b

    xn = ln(x, p["ln1_g"][0], p["ln1_b"][0])
    q = xn @ p["wq"] + p["bq"][0]
    k = xn @ p["wk"] + p["bk"][0]
    v = xn @ p["wv"] + p["bv"][0]
    q = q.reshape(B, N, H, HD).transpose(0, 2, 1, 3)
    k = k.reshape(B, N, H, HD).transpose(0, 2, 1, 3)
    v = v.reshape(B, N, H, HD).transpose(0, 2, 1, 3)
    s = jnp.einsum("bhqd,bhkd->bhqk", q, k) / math.sqrt(HD)
    bias = jnp.where(src_padding_mask, -1e30, 0.0)[:, None, None, :]
    a = jax.nn.softmax(s + bias, axis=-1)
    o = jnp.einsum("bhqk,bhkd->bhqd", a, v).transpose(0, 2, 1, 3).reshape(B, N, D)
    o = o @ p["wo"] + p["bo"][0]
    x1 = x + o
    xn2 = ln(x1, p["ln2_g"][0], p["ln2_b"][0])
    h1 = jnp.maximum(xn2 @ p["w1"] + p["b1"][0], 0.0)
    ff = h1 @ p["w2"] + p["b2"][0]
    return x1 + ff


# ------------------------------- main ----------------------------------------
def make_params(key):
    ks = jax.random.split(key, 12)
    scale = 0.05
    return {
        "ln1_g": jnp.ones((1, D), jnp.float32),
        "ln1_b": jnp.zeros((1, D), jnp.float32),
        # weights stored pre-transposed so the kernel computes x @ W + b
        "wq": scale * jax.random.normal(ks[0], (D, D), jnp.float32),
        "wk": scale * jax.random.normal(ks[1], (D, D), jnp.float32),
        "wv": scale * jax.random.normal(ks[2], (D, D), jnp.float32),
        "bq": scale * jax.random.normal(ks[3], (1, D), jnp.float32),
        "bk": scale * jax.random.normal(ks[4], (1, D), jnp.float32),
        "bv": scale * jax.random.normal(ks[5], (1, D), jnp.float32),
        "wo": scale * jax.random.normal(ks[6], (D, D), jnp.float32),
        "bo": scale * jax.random.normal(ks[7], (1, D), jnp.float32),
        "ln2_g": jnp.ones((1, D), jnp.float32),
        "ln2_b": jnp.zeros((1, D), jnp.float32),
        "w1": scale * jax.random.normal(ks[8], (D, FF), jnp.float32),
        "b1": scale * jax.random.normal(ks[9], (1, FF), jnp.float32),
        "w2": scale * jax.random.normal(ks[10], (FF, D), jnp.float32),
        "b2": scale * jax.random.normal(ks[11], (1, D), jnp.float32),
    }


if __name__ == "__main__":
    key = jax.random.PRNGKey(0)
    kx, kp = jax.random.split(key)
    x = jax.random.normal(kx, (B, N, D), jnp.float32)
    # last 2 patches of batch element 1 are padding
    src_padding_mask = jnp.zeros((B, N), dtype=bool).at[1, -2:].set(True)

    params = make_params(kp)                    # torch-layout params (f32)
    kparams = prepare_kernel_params(params)     # packed into 2 slabs, once

    out = hw_encoder(x, src_padding_mask, kparams)
    out = jax.block_until_ready(out)

    ref = hw_encoder_ref(x, src_padding_mask, params)
    assert out.shape == (B, N, D)
    if MATMUL_DTYPE == jnp.float32:
        atol = rtol = 1e-4      # exact-reciprocal f32 parity path
    else:
        atol = rtol = 1e-2      # bf16 MXU operands (f32 accumulation)
    assert jnp.allclose(out, ref, atol=atol, rtol=rtol), "mismatch vs reference"
    print("KERNEL_OK")
</pallas_src>

<mosaic_0001>
module attributes {stable_mosaic.version = 11 : i64} {
  func.func @hw_encoder_kernel(%arg0: memref<16x32xf32, #tpu.memory_space<vmem>>, %arg1: memref<2x1x8xf32, #tpu.memory_space<vmem>>, %arg2: memref<8x128xf32, #tpu.memory_space<vmem>>, %arg3: memref<64x512xbf16, #tpu.memory_space<vmem>>, %arg4: memref<16x32xf32, #tpu.memory_space<vmem>>) attributes {dimension_semantics = [], scalar_prefetch = 0 : i64, scratch_operands = 0 : i64, tpu.core_type = #tpu.core_type<tc>} {
    %c0 = arith.constant 0 : index
    %c0_0 = arith.constant 0 : index
    %0 = vector.load %arg0[%c0, %c0_0] : memref<16x32xf32, #tpu.memory_space<vmem>>, vector<16x32xf32>
    %c0_1 = arith.constant 0 : index
    %c0_2 = arith.constant 0 : index
    %c0_3 = arith.constant 0 : index
    %1 = vector.load %arg1[%c0_1, %c0_2, %c0_3] : memref<2x1x8xf32, #tpu.memory_space<vmem>>, vector<2x1x8xf32>
    %c0_4 = arith.constant 0 : index
    %c0_5 = arith.constant 0 : index
    %2 = vector.load %arg2[%c0_4, %c0_5] : memref<8x128xf32, #tpu.memory_space<vmem>>, vector<1x32xf32>
    %c1 = arith.constant 1 : index
    %c0_6 = arith.constant 0 : index
    %3 = vector.load %arg2[%c1, %c0_6] : memref<8x128xf32, #tpu.memory_space<vmem>>, vector<1x32xf32>
    %c2 = arith.constant 2 : index
    %c0_7 = arith.constant 0 : index
    %4 = vector.load %arg2[%c2, %c0_7] : memref<8x128xf32, #tpu.memory_space<vmem>>, vector<1x96xf32>
    %c3 = arith.constant 3 : index
    %c0_8 = arith.constant 0 : index
    %5 = vector.load %arg2[%c3, %c0_8] : memref<8x128xf32, #tpu.memory_space<vmem>>, vector<1x32xf32>
    %c4 = arith.constant 4 : index
    %c0_9 = arith.constant 0 : index
    %6 = vector.load %arg2[%c4, %c0_9] : memref<8x128xf32, #tpu.memory_space<vmem>>, vector<1x32xf32>
    %c5 = arith.constant 5 : index
    %c0_10 = arith.constant 0 : index
    %7 = vector.load %arg2[%c5, %c0_10] : memref<8x128xf32, #tpu.memory_space<vmem>>, vector<1x32xf32>
    %c6 = arith.constant 6 : index
    %c0_11 = arith.constant 0 : index
    %8 = vector.load %arg2[%c6, %c0_11] : memref<8x128xf32, #tpu.memory_space<vmem>>, vector<1x64xf32>
    %c7 = arith.constant 7 : index
    %c0_12 = arith.constant 0 : index
    %9 = vector.load %arg2[%c7, %c0_12] : memref<8x128xf32, #tpu.memory_space<vmem>>, vector<1x32xf32>
    %c0_13 = arith.constant 0 : index
    %c0_14 = arith.constant 0 : index
    %10 = vector.load %arg3[%c0_13, %c0_14] : memref<64x512xbf16, #tpu.memory_space<vmem>>, vector<32x96xbf16>
    %c0_15 = arith.constant 0 : index
    %c128 = arith.constant 128 : index
    %11 = vector.load %arg3[%c0_15, %c128] : memref<64x512xbf16, #tpu.memory_space<vmem>>, vector<32x32xbf16>
    %c0_16 = arith.constant 0 : index
    %c256 = arith.constant 256 : index
    %12 = vector.load %arg3[%c0_16, %c256] : memref<64x512xbf16, #tpu.memory_space<vmem>>, vector<32x64xbf16>
    %c0_17 = arith.constant 0 : index
    %c384 = arith.constant 384 : index
    %13 = vector.load %arg3[%c0_17, %c384] : memref<64x512xbf16, #tpu.memory_space<vmem>>, vector<64x32xbf16>
    %cst = arith.constant dense<0.000000e+00> : vector<16xf32>
    %14 = vector.multi_reduction <add>, %0, %cst [1] : vector<16x32xf32> to vector<16xf32>
    %15 = vector.shape_cast %14 : vector<16xf32> to vector<16x1xf32>
    %cst_18 = arith.constant 3.200000e+01 : f32
    %16 = vector.broadcast %cst_18 : f32 to vector<16x1xf32>
    %17 = arith.divf %15, %16 : vector<16x1xf32>
    %18 = vector.broadcast %17 : vector<16x1xf32> to vector<16x32xf32>
    %19 = arith.subf %0, %18 : vector<16x32xf32>
    %20 = arith.mulf %19, %19 : vector<16x32xf32>
    %cst_19 = arith.constant dense<0.000000e+00> : vector<16xf32>
    %21 = vector.multi_reduction <add>, %20, %cst_19 [1] : vector<16x32xf32> to vector<16xf32>
    %22 = vector.shape_cast %21 : vector<16xf32> to vector<16x1xf32>
    %cst_20 = arith.constant 3.200000e+01 : f32
    %23 = vector.broadcast %cst_20 : f32 to vector<16x1xf32>
    %24 = arith.divf %22, %23 : vector<16x1xf32>
    %cst_21 = arith.constant 9.99999974E-6 : f32
    %25 = vector.broadcast %cst_21 : f32 to vector<16x1xf32>
    %26 = arith.addf %24, %25 : vector<16x1xf32>
    %27 = math.rsqrt %26 : vector<16x1xf32>
    %28 = vector.broadcast %27 : vector<16x1xf32> to vector<16x32xf32>
    %29 = arith.mulf %19, %28 : vector<16x32xf32>
    %30 = vector.broadcast %2 : vector<1x32xf32> to vector<16x32xf32>
    %31 = arith.mulf %29, %30 : vector<16x32xf32>
    %32 = vector.broadcast %3 : vector<1x32xf32> to vector<16x32xf32>
    %33 = arith.addf %31, %32 : vector<16x32xf32>
    %34 = arith.truncf %33 : vector<16x32xf32> to vector<16x32xbf16>
    %cst_22 = arith.constant dense<0.000000e+00> : vector<16x96xf32>
    %35 = tpu.matmul %34, %10, %cst_22 {dimension_numbers = #tpu.dot_dimension_numbers<[1], [0], [0], [1], [0, 0, 1, 1], [], []>} : vector<16x32xbf16>, vector<32x96xbf16>, vector<16x96xf32> -> vector<16x96xf32>
    %36 = vector.broadcast %4 : vector<1x96xf32> to vector<16x96xf32>
    %37 = arith.addf %35, %36 : vector<16x96xf32>
    %38 = arith.truncf %37 : vector<16x96xf32> to vector<16x96xbf16>
    %cst_23 = arith.constant 0.000000e+00 : f32
    %39 = vector.broadcast %cst_23 : f32 to vector<16x32xf32>
    %40 = vector.broadcast %5 : vector<1x32xf32> to vector<16x32xf32>
    %41 = arith.addf %39, %40 : vector<16x32xf32>
    %42 = vector.extract_strided_slice %38 {offsets = [0, 0], sizes = [16, 8], strides = [1, 1]} : vector<16x96xbf16> to vector<16x8xbf16>
    %43 = vector.shape_cast %42 : vector<16x8xbf16> to vector<2x8x8xbf16>
    %44 = vector.extract_strided_slice %38 {offsets = [0, 32], sizes = [16, 8], strides = [1, 1]} : vector<16x96xbf16> to vector<16x8xbf16>
    %45 = vector.shape_cast %44 : vector<16x8xbf16> to vector<2x8x8xbf16>
    %46 = vector.extract_strided_slice %38 {offsets = [0, 64], sizes = [16, 8], strides = [1, 1]} : vector<16x96xbf16> to vector<16x8xbf16>
    %47 = vector.shape_cast %46 : vector<16x8xbf16> to vector<2x8x8xbf16>
    "tpu.trace_start"() <{level = 10 : i32, message = "bqd,bkd->bqk"}> : () -> ()
    %cst_24 = arith.constant dense<0.000000e+00> : vector<2x8x8xf32>
    %48 = tpu.matmul %43, %45, %cst_24 {dimension_numbers = #tpu.dot_dimension_numbers<[2], [2], [1], [1], [0, 0, 0, 1, 1, 1], [0], [0]>} : vector<2x8x8xbf16>, vector<2x8x8xbf16>, vector<2x8x8xf32> -> vector<2x8x8xf32>
    "tpu.trace_stop"() : () -> ()
    %49 = vector.broadcast %1 : vector<2x1x8xf32> to vector<2x8x8xf32>
    %50 = arith.addf %48, %49 : vector<2x8x8xf32>
    %cst_25 = arith.constant dense<0xFF800000> : vector<2x8xf32>
    %51 = vector.multi_reduction <maximumf>, %50, %cst_25 [2] : vector<2x8x8xf32> to vector<2x8xf32>
    %52 = vector.shape_cast %51 : vector<2x8xf32> to vector<2x8x1xf32>
    %53 = vector.broadcast %52 : vector<2x8x1xf32> to vector<2x8x8xf32>
    %54 = arith.subf %50, %53 : vector<2x8x8xf32>
    %55 = math.exp %54 : vector<2x8x8xf32>
    %cst_26 = arith.constant dense<0.000000e+00> : vector<2x8xf32>
    %56 = vector.multi_reduction <add>, %55, %cst_26 [2] : vector<2x8x8xf32> to vector<2x8xf32>
    %57 = vector.shape_cast %56 : vector<2x8xf32> to vector<2x8x1xf32>
    %58 = tpu.reciprocal %57 {approx = true} : vector<2x8x1xf32> -> vector<2x8x1xf32>
    %59 = vector.broadcast %58 : vector<2x8x1xf32> to vector<2x8x8xf32>
    %60 = arith.mulf %55, %59 : vector<2x8x8xf32>
    %61 = arith.truncf %60 : vector<2x8x8xf32> to vector<2x8x8xbf16>
    "tpu.trace_start"() <{level = 10 : i32, message = "bqk,bkd->bqd"}> : () -> ()
    %cst_27 = arith.constant dense<0.000000e+00> : vector<2x8x8xf32>
    %62 = tpu.matmul %61, %47, %cst_27 {dimension_numbers = #tpu.dot_dimension_numbers<[2], [1], [1], [2], [0, 0, 0, 1, 1, 2], [0], [0]>} : vector<2x8x8xbf16>, vector<2x8x8xbf16>, vector<2x8x8xf32> -> vector<2x8x8xf32>
    "tpu.trace_stop"() : () -> ()
    %63 = vector.shape_cast %62 : vector<2x8x8xf32> to vector<16x8xf32>
    %64 = arith.truncf %63 : vector<16x8xf32> to vector<16x8xbf16>
    %65 = vector.extract_strided_slice %11 {offsets = [0, 0], sizes = [8, 32], strides = [1, 1]} : vector<32x32xbf16> to vector<8x32xbf16>
    %cst_28 = arith.constant dense<0.000000e+00> : vector<16x32xf32>
    %66 = tpu.matmul %64, %65, %cst_28 {dimension_numbers = #tpu.dot_dimension_numbers<[1], [0], [0], [1], [0, 0, 1, 1], [], []>} : vector<16x8xbf16>, vector<8x32xbf16>, vector<16x32xf32> -> vector<16x32xf32>
    %67 = arith.addf %41, %66 : vector<16x32xf32>
    %68 = vector.extract_strided_slice %38 {offsets = [0, 8], sizes = [16, 8], strides = [1, 1]} : vector<16x96xbf16> to vector<16x8xbf16>
    %69 = vector.shape_cast %68 : vector<16x8xbf16> to vector<2x8x8xbf16>
    %70 = vector.extract_strided_slice %38 {offsets = [0, 40], sizes = [16, 8], strides = [1, 1]} : vector<16x96xbf16> to vector<16x8xbf16>
    %71 = vector.shape_cast %70 : vector<16x8xbf16> to vector<2x8x8xbf16>
    %72 = vector.extract_strided_slice %38 {offsets = [0, 72], sizes = [16, 8], strides = [1, 1]} : vector<16x96xbf16> to vector<16x8xbf16>
    %73 = vector.shape_cast %72 : vector<16x8xbf16> to vector<2x8x8xbf16>
    "tpu.trace_start"() <{level = 10 : i32, message = "bqd,bkd->bqk"}> : () -> ()
    %cst_29 = arith.constant dense<0.000000e+00> : vector<2x8x8xf32>
    %74 = tpu.matmul %69, %71, %cst_29 {dimension_numbers = #tpu.dot_dimension_numbers<[2], [2], [1], [1], [0, 0, 0, 1, 1, 1], [0], [0]>} : vector<2x8x8xbf16>, vector<2x8x8xbf16>, vector<2x8x8xf32> -> vector<2x8x8xf32>
    "tpu.trace_stop"() : () -> ()
    %75 = vector.broadcast %1 : vector<2x1x8xf32> to vector<2x8x8xf32>
    %76 = arith.addf %74, %75 : vector<2x8x8xf32>
    %cst_30 = arith.constant dense<0xFF800000> : vector<2x8xf32>
    %77 = vector.multi_reduction <maximumf>, %76, %cst_30 [2] : vector<2x8x8xf32> to vector<2x8xf32>
    %78 = vector.shape_cast %77 : vector<2x8xf32> to vector<2x8x1xf32>
    %79 = vector.broadcast %78 : vector<2x8x1xf32> to vector<2x8x8xf32>
    %80 = arith.subf %76, %79 : vector<2x8x8xf32>
    %81 = math.exp %80 : vector<2x8x8xf32>
    %cst_31 = arith.constant dense<0.000000e+00> : vector<2x8xf32>
    %82 = vector.multi_reduction <add>, %81, %cst_31 [2] : vector<2x8x8xf32> to vector<2x8xf32>
    %83 = vector.shape_cast %82 : vector<2x8xf32> to vector<2x8x1xf32>
    %84 = tpu.reciprocal %83 {approx = true} : vector<2x8x1xf32> -> vector<2x8x1xf32>
    %85 = vector.broadcast %84 : vector<2x8x1xf32> to vector<2x8x8xf32>
    %86 = arith.mulf %81, %85 : vector<2x8x8xf32>
    %87 = arith.truncf %86 : vector<2x8x8xf32> to vector<2x8x8xbf16>
    "tpu.trace_start"() <{level = 10 : i32, message = "bqk,bkd->bqd"}> : () -> ()
    %cst_32 = arith.constant dense<0.000000e+00> : vector<2x8x8xf32>
    %88 = tpu.matmul %87, %73, %cst_32 {dimension_numbers = #tpu.dot_dimension_numbers<[2], [1], [1], [2], [0, 0, 0, 1, 1, 2], [0], [0]>} : vector<2x8x8xbf16>, vector<2x8x8xbf16>, vector<2x8x8xf32> -> vector<2x8x8xf32>
    "tpu.trace_stop"() : () -> ()
    %89 = vector.shape_cast %88 : vector<2x8x8xf32> to vector<16x8xf32>
    %90 = arith.truncf %89 : vector<16x8xf32> to vector<16x8xbf16>
    %91 = vector.extract_strided_slice %11 {offsets = [8, 0], sizes = [8, 32], strides = [1, 1]} : vector<32x32xbf16> to vector<8x32xbf16>
    %cst_33 = arith.constant dense<0.000000e+00> : vector<16x32xf32>
    %92 = tpu.matmul %90, %91, %cst_33 {dimension_numbers = #tpu.dot_dimension_numbers<[1], [0], [0], [1], [0, 0, 1, 1], [], []>} : vector<16x8xbf16>, vector<8x32xbf16>, vector<16x32xf32> -> vector<16x32xf32>
    %93 = arith.addf %67, %92 : vector<16x32xf32>
    %94 = vector.extract_strided_slice %38 {offsets = [0, 16], sizes = [16, 8], strides = [1, 1]} : vector<16x96xbf16> to vector<16x8xbf16>
    %95 = vector.shape_cast %94 : vector<16x8xbf16> to vector<2x8x8xbf16>
    %96 = vector.extract_strided_slice %38 {offsets = [0, 48], sizes = [16, 8], strides = [1, 1]} : vector<16x96xbf16> to vector<16x8xbf16>
    %97 = vector.shape_cast %96 : vector<16x8xbf16> to vector<2x8x8xbf16>
    %98 = vector.extract_strided_slice %38 {offsets = [0, 80], sizes = [16, 8], strides = [1, 1]} : vector<16x96xbf16> to vector<16x8xbf16>
    %99 = vector.shape_cast %98 : vector<16x8xbf16> to vector<2x8x8xbf16>
    "tpu.trace_start"() <{level = 10 : i32, message = "bqd,bkd->bqk"}> : () -> ()
    %cst_34 = arith.constant dense<0.000000e+00> : vector<2x8x8xf32>
    %100 = tpu.matmul %95, %97, %cst_34 {dimension_numbers = #tpu.dot_dimension_numbers<[2], [2], [1], [1], [0, 0, 0, 1, 1, 1], [0], [0]>} : vector<2x8x8xbf16>, vector<2x8x8xbf16>, vector<2x8x8xf32> -> vector<2x8x8xf32>
    "tpu.trace_stop"() : () -> ()
    %101 = vector.broadcast %1 : vector<2x1x8xf32> to vector<2x8x8xf32>
    %102 = arith.addf %100, %101 : vector<2x8x8xf32>
    %cst_35 = arith.constant dense<0xFF800000> : vector<2x8xf32>
    %103 = vector.multi_reduction <maximumf>, %102, %cst_35 [2] : vector<2x8x8xf32> to vector<2x8xf32>
    %104 = vector.shape_cast %103 : vector<2x8xf32> to vector<2x8x1xf32>
    %105 = vector.broadcast %104 : vector<2x8x1xf32> to vector<2x8x8xf32>
    %106 = arith.subf %102, %105 : vector<2x8x8xf32>
    %107 = math.exp %106 : vector<2x8x8xf32>
    %cst_36 = arith.constant dense<0.000000e+00> : vector<2x8xf32>
    %108 = vector.multi_reduction <add>, %107, %cst_36 [2] : vector<2x8x8xf32> to vector<2x8xf32>
    %109 = vector.shape_cast %108 : vector<2x8xf32> to vector<2x8x1xf32>
    %110 = tpu.reciprocal %109 {approx = true} : vector<2x8x1xf32> -> vector<2x8x1xf32>
    %111 = vector.broadcast %110 : vector<2x8x1xf32> to vector<2x8x8xf32>
    %112 = arith.mulf %107, %111 : vector<2x8x8xf32>
    %113 = arith.truncf %112 : vector<2x8x8xf32> to vector<2x8x8xbf16>
    "tpu.trace_start"() <{level = 10 : i32, message = "bqk,bkd->bqd"}> : () -> ()
    %cst_37 = arith.constant dense<0.000000e+00> : vector<2x8x8xf32>
    %114 = tpu.matmul %113, %99, %cst_37 {dimension_numbers = #tpu.dot_dimension_numbers<[2], [1], [1], [2], [0, 0, 0, 1, 1, 2], [0], [0]>} : vector<2x8x8xbf16>, vector<2x8x8xbf16>, vector<2x8x8xf32> -> vector<2x8x8xf32>
    "tpu.trace_stop"() : () -> ()
    %115 = vector.shape_cast %114 : vector<2x8x8xf32> to vector<16x8xf32>
    %116 = arith.truncf %115 : vector<16x8xf32> to vector<16x8xbf16>
    %117 = vector.extract_strided_slice %11 {offsets = [16, 0], sizes = [8, 32], strides = [1, 1]} : vector<32x32xbf16> to vector<8x32xbf16>
    %cst_38 = arith.constant dense<0.000000e+00> : vector<16x32xf32>
    %118 = tpu.matmul %116, %117, %cst_38 {dimension_numbers = #tpu.dot_dimension_numbers<[1], [0], [0], [1], [0, 0, 1, 1], [], []>} : vector<16x8xbf16>, vector<8x32xbf16>, vector<16x32xf32> -> vector<16x32xf32>
    %119 = arith.addf %93, %118 : vector<16x32xf32>
    %120 = vector.extract_strided_slice %38 {offsets = [0, 24], sizes = [16, 8], strides = [1, 1]} : vector<16x96xbf16> to vector<16x8xbf16>
    %121 = vector.shape_cast %120 : vector<16x8xbf16> to vector<2x8x8xbf16>
    %122 = vector.extract_strided_slice %38 {offsets = [0, 56], sizes = [16, 8], strides = [1, 1]} : vector<16x96xbf16> to vector<16x8xbf16>
    %123 = vector.shape_cast %122 : vector<16x8xbf16> to vector<2x8x8xbf16>
    %124 = vector.extract_strided_slice %38 {offsets = [0, 88], sizes = [16, 8], strides = [1, 1]} : vector<16x96xbf16> to vector<16x8xbf16>
    %125 = vector.shape_cast %124 : vector<16x8xbf16> to vector<2x8x8xbf16>
    "tpu.trace_start"() <{level = 10 : i32, message = "bqd,bkd->bqk"}> : () -> ()
    %cst_39 = arith.constant dense<0.000000e+00> : vector<2x8x8xf32>
    %126 = tpu.matmul %121, %123, %cst_39 {dimension_numbers = #tpu.dot_dimension_numbers<[2], [2], [1], [1], [0, 0, 0, 1, 1, 1], [0], [0]>} : vector<2x8x8xbf16>, vector<2x8x8xbf16>, vector<2x8x8xf32> -> vector<2x8x8xf32>
    "tpu.trace_stop"() : () -> ()
    %127 = vector.broadcast %1 : vector<2x1x8xf32> to vector<2x8x8xf32>
    %128 = arith.addf %126, %127 : vector<2x8x8xf32>
    %cst_40 = arith.constant dense<0xFF800000> : vector<2x8xf32>
    %129 = vector.multi_reduction <maximumf>, %128, %cst_40 [2] : vector<2x8x8xf32> to vector<2x8xf32>
    %130 = vector.shape_cast %129 : vector<2x8xf32> to vector<2x8x1xf32>
    %131 = vector.broadcast %130 : vector<2x8x1xf32> to vector<2x8x8xf32>
    %132 = arith.subf %128, %131 : vector<2x8x8xf32>
    %133 = math.exp %132 : vector<2x8x8xf32>
    %cst_41 = arith.constant dense<0.000000e+00> : vector<2x8xf32>
    %134 = vector.multi_reduction <add>, %133, %cst_41 [2] : vector<2x8x8xf32> to vector<2x8xf32>
    %135 = vector.shape_cast %134 : vector<2x8xf32> to vector<2x8x1xf32>
    %136 = tpu.reciprocal %135 {approx = true} : vector<2x8x1xf32> -> vector<2x8x1xf32>
    %137 = vector.broadcast %136 : vector<2x8x1xf32> to vector<2x8x8xf32>
    %138 = arith.mulf %133, %137 : vector<2x8x8xf32>
    %139 = arith.truncf %138 : vector<2x8x8xf32> to vector<2x8x8xbf16>
    "tpu.trace_start"() <{level = 10 : i32, message = "bqk,bkd->bqd"}> : () -> ()
    %cst_42 = arith.constant dense<0.000000e+00> : vector<2x8x8xf32>
    %140 = tpu.matmul %139, %125, %cst_42 {dimension_numbers = #tpu.dot_dimension_numbers<[2], [1], [1], [2], [0, 0, 0, 1, 1, 2], [0], [0]>} : vector<2x8x8xbf16>, vector<2x8x8xbf16>, vector<2x8x8xf32> -> vector<2x8x8xf32>
    "tpu.trace_stop"() : () -> ()
    %141 = vector.shape_cast %140 : vector<2x8x8xf32> to vector<16x8xf32>
    %142 = arith.truncf %141 : vector<16x8xf32> to vector<16x8xbf16>
    %143 = vector.extract_strided_slice %11 {offsets = [24, 0], sizes = [8, 32], strides = [1, 1]} : vector<32x32xbf16> to vector<8x32xbf16>
    %cst_43 = arith.constant dense<0.000000e+00> : vector<16x32xf32>
    %144 = tpu.matmul %142, %143, %cst_43 {dimension_numbers = #tpu.dot_dimension_numbers<[1], [0], [0], [1], [0, 0, 1, 1], [], []>} : vector<16x8xbf16>, vector<8x32xbf16>, vector<16x32xf32> -> vector<16x32xf32>
    %145 = arith.addf %119, %144 : vector<16x32xf32>
    %146 = arith.addf %0, %145 : vector<16x32xf32>
    %cst_44 = arith.constant dense<0.000000e+00> : vector<16xf32>
    %147 = vector.multi_reduction <add>, %146, %cst_44 [1] : vector<16x32xf32> to vector<16xf32>
    %148 = vector.shape_cast %147 : vector<16xf32> to vector<16x1xf32>
    %cst_45 = arith.constant 3.200000e+01 : f32
    %149 = vector.broadcast %cst_45 : f32 to vector<16x1xf32>
    %150 = arith.divf %148, %149 : vector<16x1xf32>
    %151 = vector.broadcast %150 : vector<16x1xf32> to vector<16x32xf32>
    %152 = arith.subf %146, %151 : vector<16x32xf32>
    %153 = arith.mulf %152, %152 : vector<16x32xf32>
    %cst_46 = arith.constant dense<0.000000e+00> : vector<16xf32>
    %154 = vector.multi_reduction <add>, %153, %cst_46 [1] : vector<16x32xf32> to vector<16xf32>
    %155 = vector.shape_cast %154 : vector<16xf32> to vector<16x1xf32>
    %cst_47 = arith.constant 3.200000e+01 : f32
    %156 = vector.broadcast %cst_47 : f32 to vector<16x1xf32>
    %157 = arith.divf %155, %156 : vector<16x1xf32>
    %cst_48 = arith.constant 9.99999974E-6 : f32
    %158 = vector.broadcast %cst_48 : f32 to vector<16x1xf32>
    %159 = arith.addf %157, %158 : vector<16x1xf32>
    %160 = math.rsqrt %159 : vector<16x1xf32>
    %161 = vector.broadcast %160 : vector<16x1xf32> to vector<16x32xf32>
    %162 = arith.mulf %152, %161 : vector<16x32xf32>
    %163 = vector.broadcast %6 : vector<1x32xf32> to vector<16x32xf32>
    %164 = arith.mulf %162, %163 : vector<16x32xf32>
    %165 = vector.broadcast %7 : vector<1x32xf32> to vector<16x32xf32>
    %166 = arith.addf %164, %165 : vector<16x32xf32>
    %167 = arith.truncf %166 : vector<16x32xf32> to vector<16x32xbf16>
    %cst_49 = arith.constant dense<0.000000e+00> : vector<16x64xf32>
    %168 = tpu.matmul %167, %12, %cst_49 {dimension_numbers = #tpu.dot_dimension_numbers<[1], [0], [0], [1], [0, 0, 1, 1], [], []>} : vector<16x32xbf16>, vector<32x64xbf16>, vector<16x64xf32> -> vector<16x64xf32>
    %169 = vector.broadcast %8 : vector<1x64xf32> to vector<16x64xf32>
    %170 = arith.addf %168, %169 : vector<16x64xf32>
    %cst_50 = arith.constant 0.000000e+00 : f32
    %171 = vector.broadcast %cst_50 : f32 to vector<16x64xf32>
    %172 = arith.maximumf %170, %171 : vector<16x64xf32>
    %173 = arith.truncf %172 : vector<16x64xf32> to vector<16x64xbf16>
    %cst_51 = arith.constant dense<0.000000e+00> : vector<16x32xf32>
    %174 = tpu.matmul %173, %13, %cst_51 {dimension_numbers = #tpu.dot_dimension_numbers<[1], [0], [0], [1], [0, 0, 1, 1], [], []>} : vector<16x64xbf16>, vector<64x32xbf16>, vector<16x32xf32> -> vector<16x32xf32>
    %175 = vector.broadcast %9 : vector<1x32xf32> to vector<16x32xf32>
    %176 = arith.addf %174, %175 : vector<16x32xf32>
    %177 = arith.addf %146, %176 : vector<16x32xf32>
    %c0_52 = arith.constant 0 : index
    %c0_53 = arith.constant 0 : index
    %178 = vector.load %arg4[%c0_52, %c0_53] : memref<16x32xf32, #tpu.memory_space<vmem>>, vector<16x32xf32>
    tpu.vector_store %arg4[%c0_52, %c0_53], %177 {strides = array<i32>} : memref<16x32xf32, #tpu.memory_space<vmem>>, vector<16x32xf32>,
    return
  }
}

</mosaic_0001>

<bundles_post_ra>
// kernel: hw_encoder.1
= control target key start
LH: loop header
LB: loop body
LE: loop exit
PB: predicated region body
PF: predicated region fallthrough
CT: control target
= control target key end

     0   :  { %9 = vsyncpa [#allocation3], 0  ;;  %s1347_s0 = inlined_call_operand.hbm [shape: f32[16,32], index: 0, kind: input, shape index: {}]   ;;  %s1348_s1 = inlined_call_operand.vmem [shape: f32[2,1,8], index: 1, kind: input, shape index: {}]   ;;  %s1349_s2 = inlined_call_operand.hbm [shape: f32[8,128], index: 2, kind: input, shape index: {}]   ;;  %s1350_s3 = inlined_call_operand.hbm [shape: bf16[64,512], index: 3, kind: input, shape index: {}]   ;;  %s1351_s4 = inlined_call_operand.hbm [shape: f32[16,32], index: 4, kind: output, shape index: {}]  }
   0x1   :  { %10 = vsyncpa [#allocation6], 0  ;;  %s32_s17 = sshll.u32 %s1349_s2, 4  ;;  %s33_s17 = int_to_ptr.hbm [resolvable:$true] %s32_s17 }
   0x2   :  { %11 = vsyncpa [#allocation4], 0  ;;  %s1129_s18 = smov [#allocation5]   ;;  %s16_s22 = sshll.u32 %s1347_s0, 4  ;;  %s17_s22 = int_to_ptr.hbm [resolvable:$true] %s16_s22 }
   0x3   :  { %s34_s19 = sshll.u32 %s1129_s18, 4  ;;  %s1130_s23 = smov [#allocation2]   ;;  %s35_s19 = int_to_ptr.vmem [resolvable:$true] %s34_s19 }
   0x4   :  { %37 = dma.hbm_to_vmem [thread:$0]  %s33_s17, 128, %s35_s19, [#allocation6]  }
   0x5   :  { %s18_s24 = sshll.u32 %s1130_s23, 4  ;;  %s1131_s25 = smov 128   ;;  %s19_s24 = int_to_ptr.vmem [resolvable:$true] %s18_s24 }
   0x6   :  { %s1132_s26 = smov 8   ;;  %s42_s28 = sshll.u32 %s1350_s3, 4  ;;  %s43_s28 = int_to_ptr.hbm [resolvable:$true] %s42_s28 }
   0x7   :  { %24 = dma.hbm_to_vmem [thread:$0]  %s17_s22, 256, %s19_s24, [#allocation3], %s1131_s25, %s1131_s25, %s1132_s26  }
   0x8   :  { %s1133_s29 = smov [#allocation7]   ;;  %s1134_s0 = smov 256  }
   0x9   :  { %s44_s30 = sshll.u32 %s1133_s29, 4  ;;  %s1135_s5 = smov 16   ;;  %s45_s30 = int_to_ptr.vmem [resolvable:$true] %s44_s30 }
   0xa   :  { %50 = dma.hbm_to_vmem [thread:$0]  %s43_s28, 2048, %s45_s30, [#allocation6], %s1134_s0, %s1134_s0, %s1135_s5  }
   0xb   :  { %1123 = dma.done.wait [#allocation3], 256  }
   0xc   :  { %1124 = vsyncadd [#allocation3], 4294967040 }
   0xd   :  { %1125 = dma.done.wait [#allocation6], 2176  }
   0xe   :  { %1126 = vsyncadd [#allocation6], 4294965120  ;;  %vm96_vm0 = vcmask 261120   ;;  %v1186_v0 = vld [vmem:[#allocation2] sm:$0xff]  ;;  %v1190_v2 = vld [vmem:[#allocation2 + $0x8] sm:$0xff]  ;;  %v1136_v4 = vmov 32.0  }
   0xf   :  { %v97_v1 = vsel %vm96_vm0, %v1186_v0, 0.0  ;;  %v100_v3 = vsel %vm96_vm0, %v1190_v2, 0.0  ;;  %985 = vrcp.f32 %v1136_v4  ;;  %v898_v21 = vld [vmem:[#allocation7 + $0x20] sm:$0xf]  ;;  %v948_v22 = vld [vmem:[#allocation7 + $0x2c] sm:$0xf0] }
  0x10   :  { %98 = vadd.xlane.f32.xlu0 %v97_v1  ;;  %v899_v23 = vor.u32 %v948_v22, %v898_v21  ;;  %v894_v24 = vld [vmem:[#allocation7] sm:$0xf]  ;;  %v947_v25 = vld [vmem:[#allocation7 + $0xc] sm:$0xf0]  ;;  %v975_v46 = vld [vmem:[#allocation5] ss:$0 sm:$0xff] }
  0x11   :  { %v895_v27 = vor.u32 %v947_v25, %v894_v24  ;;  %v976_v51 = vld [vmem:[#allocation5 + $0x1] ss:$0 sm:$0xff]  ;;  %v977_v56 = vld [vmem:[#allocation5 + $0x2] ss:$0 sm:$0xff]  ;;  %s1137_s3 = smov 120   ;;  %s1138_s6 = smov 88  }
  0x12   :  { %177 = vmatpush.bf16.msra.mxu0 %v899_v23  ;;  %s1139_s7 = smov 96   ;;  %s1140_s8 = smov 80   ;;  %vm200_vm8 = vcmask 64512   ;;  %v1239_v24 = vld [vmem:[%s1348_s1 + $0x1] ss:$0 sm:$0xff]  ;;  %vm273_vm9 = vcmask 1043456  }
  0x13   :  { %s1141_s9 = smov 112   ;;  %s1142_s14 = smov 64  }
  0x14   :  { %s1144_s15 = smov 72   ;;  %s1145_s16 = smov 48  }
  0x15   :  { %v986_v5 = vpop.eup %985  ;;  %s1146_s17 = smov 104   ;;  %s1147_s18 = smov 40  }
  0x16   :  { %v104_v6 = vmul.f32 32.0, %v986_v5  ;;  %vm108_vm1 = vweird.f32 %v986_v5  ;;  %178 = vmatpush.bf16.msra.mxu0 %v895_v27  ;;  %s1148_s19 = smov [#allocation8]   ;;  %s878_s23 = sshll.u32 %s1351_s4, 4  ;;  %s879_s23 = int_to_ptr.hbm [resolvable:$true] %s878_s23 }
  0x17   :  { %s876_s20 = sshll.u32 %s1148_s19, 4  ;;  %s877_s20 = int_to_ptr.vmem [resolvable:$true] %s876_s20 }
  0x18   :  { %101 = vadd.xlane.f32.xlu0 %v100_v3  ;;  %v105_v7 = vsub.f32 1.0, %v104_v6 }
  0x1a   :  { %v106_v8 = vmul.f32 %v986_v5, %v105_v7 }
  0x1c   :  { %v107_v9 = vadd.f32 %v986_v5, %v106_v8 }
  0x1e   :  { %v1194_v10 = vsel %vm108_vm1, %v986_v5, %v107_v9  ;;  %vm850_vm1 = vcmask 523264  }
  0x83   :  { %v99_v11 = vpop.xlane.xlu0 %98 }
  0x84   :  { %v110_v12 = vmul.f32 %v1194_v10, %v99_v11 }
  0x86   :  { %v112_v13 = vsub.f32 %v1186_v0, %v110_v12 }
  0x88   :  { %v114_v14 = vmul.f32 %v112_v13, %v112_v13 }
  0x8a   :  { %v116_v15 = vsel %vm96_vm0, %v114_v14, 0.0 }
  0x8b   :  { %117 = vadd.xlane.f32.xlu1 %v116_v15  ;;  %v102_v16 = vpop.xlane.xlu0 %101 }
  0x8c   :  { %v111_v17 = vmul.f32 %v1194_v10, %v102_v16 }
  0x8e   :  { %v113_v18 = vsub.f32 %v1190_v2, %v111_v17 }
  0x90   :  { %v115_v19 = vmul.f32 %v113_v18, %v113_v18 }
  0x92   :  { %v119_v20 = vsel %vm96_vm0, %v115_v19, 0.0  ;;  %v1232_v19 = vld [vmem:[%s1348_s1] ss:$0 sm:$0xff]  ;;  %s1143_s1 = smov 56  }
  0x93   :  { %120 = vadd.xlane.f32.xlu1 %v119_v20 }
  0xfe   :  { %v118_v26 = vpop.xlane.xlu1 %117 }
  0xff   :  { %v122_v28 = vmul.f32 %v118_v26, %v1194_v10 }
 0x101   :  { %v124_v29 = vadd.f32 1e-05, %v122_v28 }
 0x103   :  { %987 = vrsqrt.f32 %v124_v29  ;;  %vm132_vm3 = vweird.f32 %v124_v29 }
 0x106   :  { %v121_v30 = vpop.xlane.xlu1 %120 }
 0x107   :  { %v123_v31 = vmul.f32 %v121_v30, %v1194_v10 }
 0x109   :  { %v988_v32 = vpop.eup %987  ;;  %v125_v33 = vadd.f32 1e-05, %v123_v31 }
 0x10a   :  { %v127_v34 = vmul.f32 %v988_v32, %v124_v29  ;;  %vm133_vm2 = vweird.f32 %v988_v32 }
 0x10b   :  { %989 = vrsqrt.f32 %v125_v33  ;;  %vm134_vm4 = vmor %vm132_vm3, %vm133_vm2  ;;  %vm142_vm6 = vweird.f32 %v125_v33 }
 0x10c   :  { %v128_v35 = vmul.f32 %v988_v32, %v127_v34 }
 0x10e   :  { %v129_v36 = vmul.f32 0.5, %v128_v35 }
 0x110   :  { %v130_v37 = vsub.f32 1.5, %v129_v36 }
 0x111   :  { %v990_v38 = vpop.eup %989 }
 0x112   :  { %v131_v39 = vmul.f32 %v988_v32, %v130_v37  ;;  %v137_v40 = vmul.f32 %v990_v38, %v125_v33  ;;  %vm143_vm5 = vweird.f32 %v990_v38 }
 0x113   :  { %vm144_vm7 = vmor %vm142_vm6, %vm143_vm5 }
 0x114   :  { %v138_v41 = vmul.f32 %v990_v38, %v137_v40  ;;  %v135_v42 = vsel %vm134_vm4, %v988_v32, %v131_v39 }
 0x115   :  { %v146_v45 = vmul.f32 %v135_v42, %v112_v13 }
 0x116   :  { %v139_v43 = vmul.f32 0.5, %v138_v41 }
 0x117   :  { %v149_v50 = vmul.f32 %v975_v46, %v146_v45 }
 0x118   :  { %v140_v44 = vsub.f32 1.5, %v139_v43 }
 0x119   :  { %v152_v53 = vadd.f32 %v976_v51, %v149_v50 }
 0x11a   :  { %v141_v47 = vmul.f32 %v990_v38, %v140_v44 }
 0x11c   :  { %v145_v48 = vsel %vm144_vm7, %v990_v38, %v141_v47 }
 0x11d   :  { %v147_v49 = vmul.f32 %v145_v48, %v113_v18 }
 0x11f   :  { %v150_v52 = vmul.f32 %v975_v46, %v147_v49 }
 0x121   :  { %v153_v54 = vadd.f32 %v976_v51, %v150_v52 }
 0x123   :  { %v154_v55 = vpack.c.bf16 %v153_v54, %v152_v53 }
 0x125   :  { %900 = vmatmul.msk.bf16.vlgmr.msra.gmra.mxu0 %vm96_vm0, %v154_v55 }
 0x1a2   :  { %v180_v57 = vpop.f32.mrf.mxu0 }
 0x1a3   :  { %v181_v58 = vadd.f32 %v977_v56, %v180_v57 }
 0x1a5   :  { %v185_v59 = vpack.c.bf16 %v181_v58, %v181_v58 }
 0x1a7   :  { %v196_v60 = vunpack.c.l.b16 %v185_v59 }
 0x1a9   :  { %v1205_v61 = vpack.c.b16 %v196_v60, %v196_v60 }
 0x1aa   :  { %v182_v62 = vpop.f32.mrf.mxu0 }
 0x1ab   :  { %v183_v63 = vadd.f32 %v977_v56, %v182_v62  ;;  %334 = vrot.lane.b32.xlu1 %v1205_v61, %s1137_s3  ;;  %336 = vrot.lane.b32.xlu0 %v1205_v61, %s1138_s6 }
 0x1ac   :  { %198 = vrot.lane.b32.xlu2 %v1205_v61, %s1139_s7 }
 0x1ad   :  { %v186_v1 = vpack.c.bf16 %v183_v63, %v183_v63 }
 0x1af   :  { %v221_v3 = vunpack.c.l.b16 %v186_v1 }
 0x1b1   :  { %v1210_v4 = vpack.c.b16 %v221_v3, %v221_v3 }
 0x1b3   :  { %471 = vrot.lane.b32.xlu1 %v1205_v61, %s1140_s8 }
 0x1b4   :  { %223 = vrot.lane.b32.xlu2 %v1210_v4, %s1139_s7 }
 0x1bb   :  { %469 = vrot.lane.b32.xlu1 %v1205_v61, %s1141_s9 }
 0x1bc   :  { %359 = vrot.lane.b32.xlu2 %v1210_v4, %s1138_s6 }
 0x1c4   :  { %357 = vrot.lane.b32.xlu2 %v1210_v4, %s1137_s3 }
 0x206   :  { %v199_v5 = vpop.permute.xlu2 %198 }
 0x207   :  { %v205_v6 = vsel %vm200_vm8, %v199_v5, 0 }
 0x208   :  { %214 = vmatpush.bf16.xpose.msra.mxu1 %v205_v6 }
 0x20e   :  { %v224_v7 = vpop.permute.xlu2 %223 }
 0x20f   :  { %901 = vmatmul.msk.bf16.vlgmr.msra.gmra.mxu1 %vm200_vm8, %v185_v59  ;;  %v229_v8 = vsel %vm200_vm8, %v224_v7, 0 }
 0x210   :  { %238 = vmatpush.bf16.xpose.msra.mxu2 %v229_v8 }
 0x216   :  { %v360_v9 = vpop.permute.xlu2 %359 }
 0x217   :  { %902 = vmatmul.msk.bf16.vlgmr.msra.gmra.mxu2 %vm200_vm8, %v186_v1  ;;  %v365_v11 = vsel %vm200_vm8, %v360_v9, 0 }
 0x218   :  { %374 = vmatpush.bf16.xpose.msrb.mxu2 %v365_v11 }
 0x21d   :  { %v335_v12 = vpop.permute.xlu1 %334  ;;  %v337_v13 = vpop.permute.xlu0 %336 }
 0x21e   :  { %v342_v14 = vsel %vm200_vm8, %v337_v13, 0  ;;  %v358_v16 = vpop.permute.xlu2 %357 }
 0x21f   :  { %351 = vmatpush.bf16.xpose.msrb.mxu1 %v342_v14 }
 0x225   :  { %v472_v15 = vpop.permute.xlu1 %471 }
 0x226   :  { %v477_v17 = vsel %vm200_vm8, %v472_v15, 0  ;;  %906 = vmatmul.msk.bf16.vlgmr.msrb.gmra.mxu1 %vm200_vm8, %v335_v12 }
 0x227   :  { %907 = vmatmul.msk.bf16.vlgmr.msrb.gmra.mxu2 %vm200_vm8, %v358_v16 }
 0x228   :  { %486 = vmatpush.bf16.xpose.msra.mxu2 %v477_v17 }
 0x22d   :  { %v470_v18 = vpop.permute.xlu1 %469 }
 0x237   :  { %911 = vmatmul.msk.bf16.vlgmr.msra.gmra.mxu2 %vm200_vm8, %v470_v18 }
 0x28c   :  { %v216_v20 = vpop.f32.mrf.mxu1 }
 0x28d   :  { %v217_v21 = vadd.f32 %v1232_v19, %v216_v20 }
 0x28f   :  { %v244_v22 = vsel %vm200_vm8, %v217_v21, -inf }
 0x290   :  { %245 = vmax.xlane.f32.xlu2 %v244_v22 }
 0x294   :  { %v218_v23 = vpop.f32.mrf.mxu1 }
 0x29a   :  { %v240_v25 = vpop.f32.mrf.mxu2 }
 0x29b   :  { %v241_v26 = vadd.f32 %v1239_v24, %v240_v25 }
 0x29d   :  { %v247_v27 = vsel %vm200_vm8, %v241_v26, -inf }
 0x29e   :  { %248 = vmax.xlane.f32.xlu0 %v247_v27 }
 0x2a2   :  { %v242_v28 = vpop.f32.mrf.mxu2 }
 0x2a3   :  { %v353_v29 = vpop.f32.mrf.mxu1 }
 0x2a4   :  { %v354_v30 = vadd.f32 %v1232_v19, %v353_v29 }
 0x2a6   :  { %v380_v31 = vsel %vm200_vm8, %v354_v30, -inf }
 0x2a7   :  { %381 = vmax.xlane.f32.xlu2 %v380_v31 }
 0x2aa   :  { %v376_v32 = vpop.f32.mrf.mxu2 }
 0x2ab   :  { %v355_v33 = vpop.f32.mrf.mxu1  ;;  %v377_v54 = vadd.f32 %v1239_v24, %v376_v32  ;;  %v80_v32 = vld [vmem:[#allocation7 + $0x4] sm:$0xf] }
 0x2ac   :  { %v316_v33 = vsel %vm273_vm9, %v80_v32, 0 }
 0x2ad   :  { %v383_v55 = vsel %vm200_vm8, %v377_v54, -inf  ;;  %325 = vmatpush.bf16.msrb.mxu0 %v316_v33 }
 0x2b2   :  { %268 = vrot.lane.b32.xlu0 %v1205_v61, %s1142_s14  ;;  %v378_v34 = vpop.f32.mrf.mxu2 }
 0x2ba   :  { %v488_v35 = vpop.f32.mrf.mxu2 }
 0x2bb   :  { %v489_v56 = vadd.f32 %v1232_v19, %v488_v35 }
 0x2bd   :  { %v515_v57 = vsel %vm200_vm8, %v489_v56, -inf }
 0x2c2   :  { %v490_v36 = vpop.f32.mrf.mxu2 }
 0x303   :  { %v246_v37 = vpop.xlane.xlu2 %245 }
 0x304   :  { %v250_v38 = vsub.f32 %v217_v21, %v246_v37 }
 0x306   :  { %v252_v39 = vmul.f32 1.442695, %v250_v38 }
 0x308   :  { %991 = vpow2.f32 %v252_v39 }
 0x30e   :  { %v992_v40 = vpop.eup %991 }
 0x30f   :  { %v256_v41 = vsel %vm200_vm8, %v992_v40, 0.0 }
 0x310   :  { %257 = vadd.xlane.f32.xlu1 %v256_v41 }
 0x311   :  { %v249_v42 = vpop.xlane.xlu0 %248 }
 0x312   :  { %v251_v43 = vsub.f32 %v241_v26, %v249_v42 }
 0x314   :  { %v254_v44 = vmul.f32 1.442695, %v251_v43 }
 0x316   :  { %993 = vpow2.f32 %v254_v44 }
 0x31a   :  { %v382_v45 = vpop.xlane.xlu2 %381 }
 0x31b   :  { %v386_v46 = vsub.f32 %v354_v30, %v382_v45 }
 0x31c   :  { %v994_v47 = vpop.eup %993 }
 0x31d   :  { %v388_v48 = vmul.f32 1.442695, %v386_v46  ;;  %v259_v49 = vsel %vm200_vm8, %v994_v47, 0.0 }
 0x31e   :  { %260 = vadd.xlane.f32.xlu2 %v259_v49 }
 0x31f   :  { %995 = vpow2.f32 %v388_v48 }
 0x324   :  { %v269_v50 = vpop.permute.xlu0 %268 }
 0x325   :  { %v996_v51 = vpop.eup %995  ;;  %v275_v52 = vsel %vm273_vm9, %v269_v50, 0 }
 0x326   :  { %284 = vmatpush.bf16.msra.mxu3 %v275_v52  ;;  %v392_v53 = vsel %vm200_vm8, %v996_v51, 0.0  ;;  %v81_v52 = vld [vmem:[#allocation7 + $0x14] sm:$0xf] }
 0x327   :  { %393 = vadd.xlane.f32.xlu0 %v392_v53 }
 0x329   :  { %404 = vrot.lane.b32.xlu1 %v1205_v61, %s1143_s1 }
 0x336   :  { %290 = vrot.lane.b32.xlu2 %v1210_v4, %s1142_s14 }
 0x33e   :  { %494 = vrot.lane.b32.xlu2 %v1210_v4, %s1140_s8 }
 0x346   :  { %492 = vrot.lane.b32.xlu2 %v1210_v4, %s1141_s9 }
 0x353   :  { %384 = vmax.xlane.f32.xlu1 %v383_v55  ;;  %v451_v55 = vsel %vm273_vm9, %v81_v52, 0 }
 0x354   :  { %460 = vmatpush.bf16.msra.mxu1 %v451_v55 }
 0x36f   :  { %516 = vmax.xlane.f32.xlu2 %v515_v57 }
 0x383   :  { %v258_v58 = vpop.xlane.xlu1 %257 }
 0x384   :  { %997 = vrcp.f32 %v258_v58 }
 0x387   :  { %606 = vrot.lane.b32.xlu2 %v1205_v61, %s1144_s15 }
 0x38a   :  { %v998_v59 = vpop.eup %997 }
 0x38b   :  { %v264_v60 = vmul.f32 %v998_v59, %v992_v40 }
 0x38d   :  { %v266_v62 = vpack.c.bf16 %v264_v60, %v264_v60 }
 0x38f   :  { %903 = vmatmul.msk.bf16.vlgmr.msra.gmra.mxu3 %vm200_vm8, %v266_v62 }
 0x391   :  { %v261_v63 = vpop.xlane.xlu2 %260 }
 0x392   :  { %999 = vrcp.f32 %v261_v63 }
 0x398   :  { %v1000_v1 = vpop.eup %999 }
 0x399   :  { %v265_v3 = vmul.f32 %v1000_v1, %v994_v47  ;;  %v291_v5 = vpop.permute.xlu2 %290 }
 0x39a   :  { %v296_v6 = vsel %vm273_vm9, %v291_v5, 0  ;;  %v394_v9 = vpop.xlane.xlu0 %393 }
 0x39b   :  { %v405_v7 = vpop.permute.xlu1 %404  ;;  %305 = vmatpush.bf16.msrb.mxu3 %v296_v6  ;;  %v267_v11 = vpack.c.bf16 %v265_v3, %v265_v3  ;;  %1001 = vrcp.f32 %v394_v9 }
 0x39c   :  { %v410_v8 = vsel %vm273_vm9, %v405_v7, 0 }
 0x39f   :  { %419 = vmatpush.bf16.msra.mxu3 %v410_v8 }
 0x3a0   :  { %904 = vmatmul.msk.bf16.vlgmr.msrb.gmra.mxu3 %vm200_vm8, %v267_v11 }
 0x3a1   :  { %v495_v12 = vpop.permute.xlu2 %494  ;;  %v1002_v14 = vpop.eup %1001 }
 0x3a2   :  { %v500_v13 = vsel %vm200_vm8, %v495_v12, 0  ;;  %v400_v15 = vmul.f32 %v1002_v14, %v996_v51 }
 0x3a3   :  { %509 = vmatpush.bf16.xpose.msrb.mxu3 %v500_v13 }
 0x3a4   :  { %v402_v16 = vpack.c.bf16 %v400_v15, %v400_v15 }
 0x3a9   :  { %v493_v17 = vpop.permute.xlu2 %492 }
 0x3b0   :  { %908 = vmatmul.msk.bf16.vlgmr.msra.gmra.mxu3 %vm200_vm8, %v402_v16 }
 0x3c0   :  { %912 = vmatmul.msk.bf16.vlgmr.msrb.gmra.mxu3 %vm200_vm8, %v493_v17 }
 0x3c6   :  { %v385_v18 = vpop.xlane.xlu1 %384 }
 0x3c7   :  { %v387_v20 = vsub.f32 %v377_v54, %v385_v18 }
 0x3c9   :  { %v390_v21 = vmul.f32 1.442695, %v387_v20 }
 0x3cb   :  { %1003 = vpow2.f32 %v390_v21 }
 0x3d1   :  { %v1004_v22 = vpop.eup %1003 }
 0x3d2   :  { %v395_v23 = vsel %vm200_vm8, %v1004_v22, 0.0 }
 0x3d3   :  { %396 = vadd.xlane.f32.xlu0 %v395_v23 }
 0x3e2   :  { %v517_v25 = vpop.xlane.xlu2 %516 }
 0x3e3   :  { %v521_v26 = vsub.f32 %v489_v56, %v517_v25 }
 0x3e5   :  { %v523_v27 = vmul.f32 1.442695, %v521_v26 }
 0x3e7   :  { %1005 = vpow2.f32 %v523_v27  ;;  %425 = vrot.lane.b32.xlu0 %v1210_v4, %s1143_s1 }
 0x3ea   :  { %v607_v28 = vpop.permute.xlu2 %606 }
 0x3eb   :  { %v612_v29 = vsel %vm200_vm8, %v607_v28, 0 }
 0x3ec   :  { %621 = vmatpush.bf16.xpose.msra.mxu3 %v612_v29 }
 0x3ed   :  { %v1006_v30 = vpop.eup %1005 }
 0x3ee   :  { %v527_v31 = vsel %vm200_vm8, %v1006_v30, 0.0 }
 0x3ef   :  { %539 = vrot.lane.b32.xlu0 %v1205_v61, %s1145_s16  ;;  %528 = vadd.xlane.f32.xlu1 %v527_v31  ;;  %v980_v31 = vld [vmem:[#allocation5 + $0x3] ss:$0 sm:$0xff] }
 0x3f7   :  { %604 = vrot.lane.b32.xlu0 %v1205_v61, %s1146_s17 }
 0x3ff   :  { %627 = vrot.lane.b32.xlu0 %v1210_v4, %s1146_s17 }
 0x408   :  { %629 = vrot.lane.b32.xlu1 %v1210_v4, %s1144_s15 }
 0x410   :  { %560 = vrot.lane.b32.xlu1 %v1210_v4, %s1145_s16 }
 0x412   :  { %v286_v34 = vpop.f32.mrf.mxu3 }
 0x41a   :  { %v288_v35 = vpop.f32.mrf.mxu3 }
 0x423   :  { %v307_v36 = vpop.f32.mrf.mxu3 }
 0x424   :  { %v311_v37 = vpack.c.bf16 %v307_v36, %v286_v34 }
 0x426   :  { %905 = vmatmul.msk.bf16.vlgmr.msrb.gmra.mxu0 %vm200_vm8, %v311_v37 }
 0x42b   :  { %v309_v38 = vpop.f32.mrf.mxu3 }
 0x433   :  { %v421_v39 = vpop.f32.mrf.mxu3 }
 0x43b   :  { %v423_v40 = vpop.f32.mrf.mxu3 }
 0x443   :  { %v511_v41 = vpop.f32.mrf.mxu3 }
 0x444   :  { %v512_v42 = vadd.f32 %v1239_v24, %v511_v41 }
 0x446   :  { %v518_v43 = vsel %vm200_vm8, %v512_v42, -inf  ;;  %v397_v45 = vpop.xlane.xlu0 %396 }
 0x447   :  { %519 = vmax.xlane.f32.xlu0 %v518_v43  ;;  %1007 = vrcp.f32 %v397_v45  ;;  %v82_v45 = vld [vmem:[#allocation7 + $0x24] sm:$0xf] }
 0x44b   :  { %v513_v44 = vpop.f32.mrf.mxu3 }
 0x44d   :  { %v1008_v46 = vpop.eup %1007 }
 0x44e   :  { %v401_v47 = vmul.f32 %v1008_v46, %v1004_v22  ;;  %v586_v46 = vsel %vm273_vm9, %v82_v45, 0 }
 0x44f   :  { %595 = vmatpush.bf16.msrb.mxu2 %v586_v46 }
 0x450   :  { %v403_v50 = vpack.c.bf16 %v401_v47, %v401_v47 }
 0x459   :  { %v426_v48 = vpop.permute.xlu0 %425 }
 0x45a   :  { %v431_v49 = vsel %vm273_vm9, %v426_v48, 0 }
 0x45b   :  { %440 = vmatpush.bf16.msra.mxu0 %v431_v49 }
 0x45e   :  { %909 = vmatmul.msk.bf16.vlgmr.msra.gmra.mxu0 %vm200_vm8, %v403_v50 }
 0x461   :  { %v540_v51 = vpop.permute.xlu0 %539 }
 0x462   :  { %v545_v53 = vsel %vm273_vm9, %v540_v51, 0  ;;  %v529_v54 = vpop.xlane.xlu1 %528 }
 0x463   :  { %1009 = vrcp.f32 %v529_v54  ;;  %554 = vmatpush.bf16.msrb.mxu0 %v545_v53 }
 0x469   :  { %v1010_v56 = vpop.eup %1009  ;;  %v605_v57 = vpop.permute.xlu0 %604 }
 0x46a   :  { %v535_v58 = vmul.f32 %v1010_v56, %v1006_v30  ;;  %916 = vmatmul.msk.bf16.vlgmr.msra.gmra.mxu3 %vm200_vm8, %v605_v57 }
 0x46c   :  { %v537_v59 = vpack.c.bf16 %v535_v58, %v535_v58 }
 0x46e   :  { %913 = vmatmul.msk.bf16.vlgmr.msrb.gmra.mxu0 %vm200_vm8, %v537_v59 }
 0x471   :  { %v628_v63 = vpop.permute.xlu0 %627 }
 0x47a   :  { %v630_v60 = vpop.permute.xlu1 %629 }
 0x47b   :  { %v635_v62 = vsel %vm200_vm8, %v630_v60, 0 }
 0x47c   :  { %644 = vmatpush.bf16.xpose.msra.mxu0 %v635_v62 }
 0x482   :  { %v561_v1 = vpop.permute.xlu1 %560 }
 0x483   :  { %v566_v3 = vsel %vm273_vm9, %v561_v1, 0  ;;  %917 = vmatmul.msk.bf16.vlgmr.msra.gmra.mxu0 %vm200_vm8, %v628_v63 }
 0x484   :  { %575 = vmatpush.bf16.msrb.mxu1 %v566_v3 }
 0x4a3   :  { %v327_v11 = vpop.f32.mrf.mxu0 }
 0x4a4   :  { %v332_v32 = vadd.f32 %v980_v31, %v327_v11 }
 0x4ab   :  { %v1297_v12 = vpop.f32.mrf.mxu0 }
 0x4ac   :  { %v333_v63 = vadd.f32 %v980_v31, %v1297_v12  ;;  %v927_v31 = vld [vmem:[#allocation7 + $0x28] sm:$0xf] }
 0x4ba   :  { %v520_v5 = vpop.xlane.xlu0 %519 }
 0x4bb   :  { %v522_v6 = vsub.f32 %v512_v42, %v520_v5 }
 0x4bd   :  { %v525_v7 = vmul.f32 1.442695, %v522_v6  ;;  %v83_v6 = vld [vmem:[#allocation7 + $0x34] sm:$0xf] }
 0x4bf   :  { %1011 = vpow2.f32 %v525_v7  ;;  %v721_v7 = vsel %vm273_vm9, %v83_v6, 0  ;;  %v953_v6 = vld [vmem:[#allocation7 + $0x58] sm:$0xf0] }
 0x4c0   :  { %730 = vmatpush.bf16.msrb.mxu3 %v721_v7 }
 0x4c5   :  { %v1012_v8 = vpop.eup %1011 }
 0x4c6   :  { %v530_v9 = vsel %vm200_vm8, %v1012_v8, 0.0 }
 0x4c7   :  { %531 = vadd.xlane.f32.xlu2 %v530_v9 }
 0x4db   :  { %v442_v13 = vpop.f32.mrf.mxu0 }
 0x4dc   :  { %v446_v14 = vpack.c.bf16 %v442_v13, %v421_v39 }
 0x4de   :  { %910 = vmatmul.msk.bf16.vlgmr.msra.gmra.mxu1 %vm200_vm8, %v446_v14 }
 0x4e3   :  { %v444_v15 = vpop.f32.mrf.mxu0 }
 0x4eb   :  { %v556_v16 = vpop.f32.mrf.mxu0 }
 0x4ed   :  { %v623_v17 = vpop.f32.mrf.mxu3 }
 0x4ee   :  { %v624_v18 = vadd.f32 %v1232_v19, %v623_v17 }
 0x4f0   :  { %v650_v20 = vsel %vm200_vm8, %v624_v18, -inf }
 0x4f1   :  { %651 = vmax.xlane.f32.xlu0 %v650_v20 }
 0x4f3   :  { %v558_v21 = vpop.f32.mrf.mxu0 }
 0x4f5   :  { %v625_v22 = vpop.f32.mrf.mxu3 }
 0x500   :  { %v646_v23 = vpop.f32.mrf.mxu0 }
 0x501   :  { %v647_v25 = vadd.f32 %v1239_v24, %v646_v23 }
 0x503   :  { %v653_v26 = vsel %vm200_vm8, %v647_v25, -inf }
 0x504   :  { %654 = vmax.xlane.f32.xlu1 %v653_v26 }
 0x508   :  { %v648_v27 = vpop.f32.mrf.mxu0 }
 0x51d   :  { %674 = vrot.lane.b32.xlu1 %v1205_v61, %s1147_s18 }
 0x53a   :  { %v532_v28 = vpop.xlane.xlu2 %531 }
 0x53b   :  { %1013 = vrcp.f32 %v532_v28 }
 0x541   :  { %v1014_v29 = vpop.eup %1013 }
 0x542   :  { %v536_v30 = vmul.f32 %v1014_v29, %v1012_v8 }
 0x544   :  { %v538_v19 = vpack.c.bf16 %v536_v30, %v536_v30 }
 0x546   :  { %914 = vmatmul.msk.bf16.vlgmr.msrb.gmra.mxu1 %vm200_vm8, %v538_v19 }
 0x55b   :  { %v462_v33 = vpop.f32.mrf.mxu1 }
 0x55c   :  { %v467_v34 = vadd.f32 %v462_v33, %v332_v32  ;;  %v950_v32 = vld [vmem:[#allocation7 + $0x34] sm:$0xf0] }
 0x55d   :  { %v928_v33 = vor.u32 %v950_v32, %v927_v31 }
 0x55f   :  { %814 = vmatpush.bf16.msrb.mxu0 %v928_v33 }
 0x563   :  { %v464_v47 = vpop.f32.mrf.mxu1 }
 0x564   :  { %v652_v35 = vpop.xlane.xlu0 %651  ;;  %v468_v1 = vadd.f32 %v464_v47, %v333_v63  ;;  %v944_v63 = vld [vmem:[#allocation7 + $0x6c] sm:$0xf] }
 0x565   :  { %v656_v24 = vsub.f32 %v624_v18, %v652_v35 }
 0x567   :  { %v658_v36 = vmul.f32 1.442695, %v656_v24  ;;  %v923_v24 = vld [vmem:[#allocation7 + $0x8] sm:$0xf] }
 0x569   :  { %1015 = vpow2.f32 %v658_v36  ;;  %v949_v36 = vld [vmem:[#allocation7 + $0x14] sm:$0xf0] }
 0x56f   :  { %v1016_v37 = vpop.eup %1015 }
 0x570   :  { %v662_v38 = vsel %vm200_vm8, %v1016_v37, 0.0 }
 0x571   :  { %663 = vadd.xlane.f32.xlu0 %v662_v38 }
 0x577   :  { %v655_v61 = vpop.xlane.xlu1 %654 }
 0x578   :  { %v657_v39 = vsub.f32 %v647_v25, %v655_v61 }
 0x57a   :  { %v660_v40 = vmul.f32 1.442695, %v657_v39 }
 0x57c   :  { %1017 = vpow2.f32 %v660_v40 }
 0x582   :  { %v1018_v41 = vpop.eup %1017 }
 0x583   :  { %v665_v42 = vsel %vm200_vm8, %v1018_v41, 0.0 }
 0x584   :  { %666 = vadd.xlane.f32.xlu2 %v665_v42 }
 0x58f   :  { %v675_v43 = vpop.permute.xlu1 %674 }
 0x590   :  { %v680_v44 = vsel %vm273_vm9, %v675_v43, 0 }
 0x591   :  { %689 = vmatpush.bf16.msra.mxu1 %v680_v44 }
 0x59c   :  { %695 = vrot.lane.b32.xlu2 %v1210_v4, %s1147_s18 }
 0x5c3   :  { %v577_v48 = vpop.f32.mrf.mxu1 }
 0x5c4   :  { %v581_v49 = vpack.c.bf16 %v577_v48, %v556_v16 }
 0x5c6   :  { %915 = vmatmul.msk.bf16.vlgmr.msrb.gmra.mxu2 %vm200_vm8, %v581_v49 }
 0x5cb   :  { %v579_v50 = vpop.f32.mrf.mxu1 }
 0x5e4   :  { %v664_v51 = vpop.xlane.xlu0 %663 }
 0x5e5   :  { %1019 = vrcp.f32 %v664_v51 }
 0x5eb   :  { %v1020_v52 = vpop.eup %1019 }
 0x5ec   :  { %v670_v53 = vmul.f32 %v1020_v52, %v1016_v37  ;;  %v924_v37 = vor.u32 %v949_v36, %v923_v24 }
 0x5ee   :  { %v672_v54 = vpack.c.bf16 %v670_v53, %v670_v53  ;;  %815 = vmatpush.bf16.msrb.mxu0 %v924_v37  ;;  %v981_v53 = vld [vmem:[#allocation5 + $0x4] ss:$0 sm:$0xff] }
 0x5f0   :  { %918 = vmatmul.msk.bf16.vlgmr.msra.gmra.mxu1 %vm200_vm8, %v672_v54 }
 0x5f7   :  { %v667_v55 = vpop.xlane.xlu2 %666 }
 0x5f8   :  { %1021 = vrcp.f32 %v667_v55 }
 0x5fe   :  { %v1022_v4 = vpop.eup %1021 }
 0x5ff   :  { %v671_v56 = vmul.f32 %v1022_v4, %v1018_v41  ;;  %v696_v57 = vpop.permute.xlu2 %695  ;;  %v982_v4 = vld [vmem:[#allocation5 + $0x5] ss:$0 sm:$0xff] }
 0x600   :  { %v701_v58 = vsel %vm273_vm9, %v696_v57, 0 }
 0x601   :  { %v673_v59 = vpack.c.bf16 %v671_v56, %v671_v56  ;;  %710 = vmatpush.bf16.msra.mxu2 %v701_v58 }
 0x604   :  { %919 = vmatmul.msk.bf16.vlgmr.msra.gmra.mxu2 %vm200_vm8, %v673_v59 }
 0x649   :  { %v597_v60 = vpop.f32.mrf.mxu2 }
 0x64a   :  { %v602_v62 = vadd.f32 %v597_v60, %v467_v34 }
 0x651   :  { %v599_v3 = vpop.f32.mrf.mxu2 }
 0x652   :  { %v603_v5 = vadd.f32 %v599_v3, %v468_v1  ;;  %v954_v1 = vld [vmem:[#allocation7 + $0x78] sm:$0xf0] }
 0x653   :  { %v945_v3 = vor.u32 %v954_v1, %v944_v63 }
 0x655   :  { %858 = vmatpush.bf16.msrb.mxu1 %v945_v3 }
 0x66d   :  { %v691_v8 = vpop.f32.mrf.mxu1 }
 0x675   :  { %v693_v9 = vpop.f32.mrf.mxu1 }
 0x676   :  { %v952_v9 = vld [vmem:[#allocation7 + $0x38] sm:$0xf0] }
 0x687   :  { %v712_v11 = vpop.f32.mrf.mxu2 }
 0x688   :  { %v716_v13 = vpack.c.bf16 %v712_v11, %v691_v8  ;;  %v936_v8 = vld [vmem:[#allocation7 + $0x2c] sm:$0xf] }
 0x689   :  { %v937_v11 = vor.u32 %v952_v9, %v936_v8 }
 0x68a   :  { %920 = vmatmul.msk.bf16.vlgmr.msrb.gmra.mxu3 %vm200_vm8, %v716_v13  ;;  %v932_v13 = vld [vmem:[#allocation7 + $0xc] sm:$0xf] }
 0x68f   :  { %v714_v14 = vpop.f32.mrf.mxu2 }
 0x690   :  { %v951_v14 = vld [vmem:[#allocation7 + $0x18] sm:$0xf0] }
 0x70d   :  { %v732_v15 = vpop.f32.mrf.mxu3 }
 0x70e   :  { %v737_v16 = vadd.f32 %v732_v15, %v602_v62  ;;  %v933_v15 = vor.u32 %v951_v14, %v932_v13 }
 0x710   :  { %v1319_v17 = vadd.f32 %v737_v16, %v1186_v0 }
 0x712   :  { %v741_v12 = vsel %vm96_vm0, %v1319_v17, 0.0 }
 0x713   :  { %742 = vadd.xlane.f32.xlu0 %v741_v12  ;;  %v983_v12 = vld [vmem:[#allocation5 + $0x6] ss:$0 sm:$0xff] }
 0x715   :  { %v734_v18 = vpop.f32.mrf.mxu3 }
 0x716   :  { %v738_v20 = vadd.f32 %v734_v18, %v603_v5  ;;  %v940_v5 = vld [vmem:[#allocation7 + $0x4c] sm:$0xf] }
 0x717   :  { %v941_v7 = vor.u32 %v953_v6, %v940_v5 }
 0x718   :  { %v1324_v21 = vadd.f32 %v738_v20, %v1190_v2 }
 0x719   :  { %859 = vmatpush.bf16.msrb.mxu1 %v941_v7 }
 0x71a   :  { %v744_v22 = vsel %vm96_vm0, %v1324_v21, 0.0 }
 0x71b   :  { %745 = vadd.xlane.f32.xlu0 %v744_v22 }
 0x71d   :  { %860 = vmatpush.bf16.msrb.mxu1 %v937_v11 }
 0x721   :  { %861 = vmatpush.bf16.msrb.mxu1 %v933_v15 }
 0x786   :  { %v743_v23 = vpop.xlane.xlu0 %742 }
 0x787   :  { %v747_v25 = vmul.f32 %v743_v23, %v1194_v10 }
 0x789   :  { %v749_v26 = vsub.f32 %v1319_v17, %v747_v25 }
 0x78b   :  { %v751_v0 = vmul.f32 %v749_v26, %v749_v26 }
 0x78d   :  { %v753_v27 = vsel %vm96_vm0, %v751_v0, 0.0  ;;  %v984_v0 = vld [vmem:[#allocation5 + $0x7] ss:$0 sm:$0xff] }
 0x78e   :  { %754 = vadd.xlane.f32.xlu0 %v753_v27  ;;  %v746_v28 = vpop.xlane.xlu0 %745 }
 0x78f   :  { %v748_v29 = vmul.f32 %v746_v28, %v1194_v10 }
 0x791   :  { %v750_v30 = vsub.f32 %v1324_v21, %v748_v29 }
 0x793   :  { %v752_v2 = vmul.f32 %v750_v30, %v750_v30 }
 0x795   :  { %v756_v19 = vsel %vm96_vm0, %v752_v2, 0.0 }
 0x796   :  { %757 = vadd.xlane.f32.xlu2 %v756_v19 }
 0x801   :  { %v755_v34 = vpop.xlane.xlu0 %754 }
 0x802   :  { %v759_v35 = vmul.f32 %v755_v34, %v1194_v10 }
 0x804   :  { %v761_v38 = vadd.f32 1e-05, %v759_v35 }
 0x806   :  { %1023 = vrsqrt.f32 %v761_v38  ;;  %vm769_vm11 = vweird.f32 %v761_v38 }
 0x809   :  { %v758_v61 = vpop.xlane.xlu2 %757 }
 0x80a   :  { %v760_v39 = vmul.f32 %v758_v61, %v1194_v10 }
 0x80c   :  { %v1024_v40 = vpop.eup %1023  ;;  %v762_v41 = vadd.f32 1e-05, %v760_v39 }
 0x80d   :  { %v764_v42 = vmul.f32 %v1024_v40, %v761_v38  ;;  %vm770_vm10 = vweird.f32 %v1024_v40 }
 0x80e   :  { %1025 = vrsqrt.f32 %v762_v41  ;;  %vm771_vm12 = vmor %vm769_vm11, %vm770_vm10  ;;  %vm779_vm14 = vweird.f32 %v762_v41 }
 0x80f   :  { %v765_v43 = vmul.f32 %v1024_v40, %v764_v42 }
 0x811   :  { %v766_v44 = vmul.f32 0.5, %v765_v43 }
 0x813   :  { %v767_v45 = vsub.f32 1.5, %v766_v44 }
 0x814   :  { %v1026_v46 = vpop.eup %1025 }
 0x815   :  { %v768_v47 = vmul.f32 %v1024_v40, %v767_v45  ;;  %v774_v48 = vmul.f32 %v1026_v46, %v762_v41  ;;  %vm780_vm13 = vweird.f32 %v1026_v46 }
 0x816   :  { %vm781_vm15 = vmor %vm779_vm14, %vm780_vm13 }
 0x817   :  { %v775_v49 = vmul.f32 %v1026_v46, %v774_v48  ;;  %v772_v50 = vsel %vm771_vm12, %v1024_v40, %v768_v47 }
 0x818   :  { %v783_v10 = vmul.f32 %v772_v50, %v749_v26 }
 0x819   :  { %v776_v51 = vmul.f32 0.5, %v775_v49 }
 0x81a   :  { %v786_v56 = vmul.f32 %v981_v53, %v783_v10 }
 0x81b   :  { %v777_v52 = vsub.f32 1.5, %v776_v51 }
 0x81c   :  { %v789_v59 = vadd.f32 %v982_v4, %v786_v56 }
 0x81d   :  { %v778_v54 = vmul.f32 %v1026_v46, %v777_v52 }
 0x81f   :  { %v782_v55 = vsel %vm781_vm15, %v1026_v46, %v778_v54 }
 0x820   :  { %v784_v57 = vmul.f32 %v782_v55, %v750_v30 }
 0x822   :  { %v787_v58 = vmul.f32 %v981_v53, %v784_v57 }
 0x824   :  { %v790_v60 = vadd.f32 %v982_v4, %v787_v58 }
 0x826   :  { %v791_v62 = vpack.c.bf16 %v790_v60, %v789_v59 }
 0x828   :  { %929 = vmatmul.msk.bf16.vlgmr.msrb.gmra.mxu0 %vm96_vm0, %v791_v62 }
 0x8a5   :  { %v817_v16 = vpop.f32.mrf.mxu0 }
 0x8a6   :  { %v818_v18 = vadd.f32 %v983_v12, %v817_v16 }
 0x8a8   :  { %v822_v23 = vmax.f32 %v818_v18, 0.0 }
 0x8ad   :  { %v819_v20 = vpop.f32.mrf.mxu0 }
 0x8ae   :  { %v820_v22 = vadd.f32 %v983_v12, %v819_v20 }
 0x8b0   :  { %v823_v25 = vmax.f32 %v820_v22, 0.0 }
 0x8b2   :  { %v824_v26 = vpack.c.bf16 %v823_v25, %v822_v23 }
 0x8b4   :  { %946 = vmatmul.msk.bf16.vlgmr.msrb.gmra.mxu1 %vm850_vm1, %v824_v26 }
 0x931   :  { %v863_v27 = vpop.f32.mrf.mxu1 }
 0x932   :  { %v864_v28 = vadd.f32 %v984_v0, %v863_v27 }
 0x934   :  { %v868_v29 = vadd.f32 %v864_v28, %v1319_v17 }
 0x936   :  { %870 = vst.msk [vmem:[#allocation8] sm:$0xff] %vm96_vm0, %v868_v29 }
 0x939   :  { %v865_v30 = vpop.f32.mrf.mxu1 }
 0x93a   :  { %v866_v2 = vadd.f32 %v984_v0, %v865_v30 }
 0x93c   :  { %v869_v19 = vadd.f32 %v866_v2, %v1324_v21 }
 0x93e   :  { %871 = vst.msk [vmem:[#allocation8 + $0x8] sm:$0xff] %vm96_vm0, %v869_v19 }
 0x93f   :  { %884 = dma.vmem_to_hbm [thread:$0]  %s877_s20, 256, %s879_s23, [#allocation4], %s1131_s25, %s1131_s25, %s1132_s26  }
 0x940   :  { %1127 = dma.done.wait [#allocation4], 256  }
 0x941   :  { %1128 = vsyncadd [#allocation4], 4294967040 }
 0x942   :  { %889 = vsyncpa [#allocation3], 1 }
 0x943   :  { %890 = vsyncpa [#allocation6], 1 }
 0x944   :  { %891 = vsyncpa [#allocation4], 1 }

</bundles_post_ra>
